<compile_context>
chip_gen: v7x
topology: tpu7x:2x2x1
jax: 0.10.0
libtpu: 0.0.40
codegen_flags: <defaults>
</compile_context>

<pallas_src>
import functools

import jax
import jax.numpy as jnp
from jax.experimental import pallas as pl
from jax.experimental.pallas import tpu as pltpu


def _round_up(x: int, m: int) -> int:
    return (x + m - 1) // m * m


def _cdiv(x: int, m: int) -> int:
    return (x + m - 1) // m


def _logits_tile(x_dec_ref, x_lm_ref, w_dec_ref, w_lm_ref, b_ref, kv, *,
                 tile_v, valid_v):
    """One (tile_m, tile_v) f32 logits tile: fused decoder + LM linear."""
    logits = jnp.dot(x_dec_ref[...], w_dec_ref[...],
                     preferred_element_type=jnp.float32)
    logits = logits + jnp.dot(x_lm_ref[...], w_lm_ref[...],
                              preferred_element_type=jnp.float32)
    logits = logits + b_ref[...].astype(jnp.float32)
    if valid_v is not None:
        # Ragged vocab: the edge weight/bias block hangs past V, so its
        # out-of-bounds lanes hold garbage.  Mask them to -inf so they cannot
        # touch the softmax normalizer (the columns themselves are dropped by
        # Pallas on the output writeback).
        col = kv * tile_v + jax.lax.broadcasted_iota(jnp.int32, (1, tile_v), 1)
        logits = jnp.where(col < valid_v, logits, -jnp.inf)
    return logits


def _online_lse_update(logits, m_ref, l_ref):
    """Streaming max / sum-exp update for one vocab tile."""
    m_prev = m_ref[...]
    m_new = jnp.maximum(m_prev, jnp.max(logits, axis=-1, keepdims=True))
    l_ref[...] = l_ref[...] * jnp.exp(m_prev - m_new) + jnp.sum(
        jnp.exp(logits - m_new), axis=-1, keepdims=True)
    m_ref[...] = m_new


def _fusion_kernel(x_dec_ref, x_lm_ref, w_dec_ref, w_lm_ref, b_ref,
                   out_ref, m_ref, l_ref, stripe_ref=None, *,
                   tile_v, valid_v):
    """Grid = (row tiles, pass, vocab tiles).

    Pass 0 accumulates the per-row log-sum-exp across vocab tiles (and, when
    `stripe_ref` is given, parks the raw logits tiles in VMEM); pass 1 writes
    `logits - lse` -- the final log-probs -- so the N x V output is written to
    HBM exactly once and never read back.
    """
    p = pl.program_id(1)
    kv = pl.program_id(2)

    @pl.when(jnp.logical_and(p == 0, kv == 0))
    def _init():
        m_ref[...] = jnp.full(m_ref.shape, -jnp.inf, m_ref.dtype)
        l_ref[...] = jnp.zeros(l_ref.shape, l_ref.dtype)

    if stripe_ref is not None:
        # VMEM-stripe mode: one matmul per vocab tile; pass 1 only normalizes
        # (no weight traffic, no recompute).
        @pl.when(p == 0)
        def _accumulate():
            logits = _logits_tile(x_dec_ref, x_lm_ref, w_dec_ref, w_lm_ref,
                                  b_ref, kv, tile_v=tile_v, valid_v=valid_v)
            stripe_ref[kv] = logits
            _online_lse_update(logits, m_ref, l_ref)

        @pl.when(p == 1)
        def _emit():
            lse = m_ref[...] + jnp.log(l_ref[...])
            out_ref[...] = stripe_ref[kv] - lse
    else:
        # Recompute mode: the stripe would not fit in VMEM; replay the cheap
        # small-K matmul in pass 1 (weights stream twice per row tile).
        logits = _logits_tile(x_dec_ref, x_lm_ref, w_dec_ref, w_lm_ref,
                              b_ref, kv, tile_v=tile_v, valid_v=valid_v)

        @pl.when(p == 0)
        def _accumulate():
            _online_lse_update(logits, m_ref, l_ref)

        @pl.when(p == 1)
        def _emit():
            out_ref[...] = logits - (m_ref[...] + jnp.log(l_ref[...]))


def simple_fusion_generator(decoder_hidden, lm_hidden, w_dec, b_dec, w_lm, *,
                            tile_rows=256, tile_vocab=1024,
                            compute_dtype=jnp.bfloat16, mode=None,
                            weight_buffering=2):
    """Fused SimpleFusionGenerator forward: log_softmax(x_d @ W_d + b + x_l @ W_l).

    Args:
      decoder_hidden: (N, D_dec)
      lm_hidden:      (N, D_lm)
      w_dec:          (D_dec, V)  pre-transposed nn.Linear weight
      b_dec:          (V,)
      w_lm:           (D_lm, V)   pre-transposed nn.Linear weight (no bias)
      tile_rows:      row-tile size (default 256; use 512 for very large N to
                      further halve the dominant weight re-stream traffic).
      tile_vocab:     vocab (lane) tile size, multiple of 128.
      compute_dtype:  MXU operand dtype.  bf16 by default -- an explicit
                      precision decision (accumulation / bias / softmax stay
                      f32); pass jnp.float32 for a slower, more exact path.
                      Store the weights in this dtype at init time so the
                      casts below are no-ops (no per-call weight copies).
      mode:           None (auto) | "stripe" | "two_pass".
      weight_buffering: pipeline depth for the weight streams (default 2);
                      3 can hide exposed weight DMA on bandwidth-starved v5e.

    Returns: (N, V) float32 log-probs.
    """
    N, d_dec = decoder_hidden.shape
    n2, d_lm = lm_hidden.shape
    d2, V = w_dec.shape
    assert n2 == N and d2 == d_dec
    assert w_lm.shape == (d_lm, V) and b_dec.shape == (V,)
    assert tile_vocab % 128 == 0 and tile_rows >= 8

    cdt = jnp.dtype(compute_dtype)
    x_dec = decoder_hidden.astype(cdt)
    x_lm = lm_hidden.astype(cdt)
    w_dec = w_dec.astype(cdt)       # no-op if weights are stored in `cdt`
    w_lm = w_lm.astype(cdt)
    b2d = b_dec.reshape(1, V).astype(jnp.float32)

    # ---- tiling -------------------------------------------------------------
    isz = cdt.itemsize
    d_tot = d_dec + d_lm
    v_pad = _round_up(V, 128)
    tile_v = min(tile_vocab, v_pad)
    num_kv = _cdiv(V, tile_v)
    v_stripe = num_kv * tile_v
    valid_v = None if v_stripe == V else V      # static: mask only when ragged

    row_align = 16 if isz < 4 else 8
    tile_m = min(tile_rows, _round_up(N, row_align))
    # v7x megacore: give the "parallel" row axis >=2 tiles for small N so both
    # TensorCores get work (only possible when N spans >1 aligned row group).
    if _cdiv(N, tile_m) < 2:
        half = _round_up(_cdiv(N, 2), row_align)
        if half < tile_m:
            tile_m = half

    # ---- VMEM budget / mode selection ---------------------------------------
    try:
        vmem_physical = int(pltpu.get_tpu_info().vmem_capacity_bytes)
    except Exception:
        vmem_physical = 64 << 20        # conservative fallback (v7x size)
    # Leave the compiler ~25% headroom (internal scratch, semaphores,
    # double-buffer overshoot): ~48 MiB on v7x, ~96 MiB on v5e/v6e.
    vmem_budget = min(vmem_physical * 3 // 4, 96 << 20)
    margin = 8 << 20

    def _footprint(tm, with_stripe):
        bytes_ = (2 * tm * d_tot * isz          # activation tiles (dbl-buffered)
                  + 2 * d_tot * tile_v * isz    # weight tiles
                  + 2 * tile_v * 4              # bias tile
                  + 2 * tm * tile_v * 4         # output tile
                  + 4 * tm * 4)                 # m / l scratch
        if with_stripe:
            bytes_ += tm * v_stripe * 4         # logits stripe (single-buffered)
        return bytes_

    if mode is None:
        # Prefer the single-matmul stripe path; shrink the row tile until the
        # f32 logits stripe fits next to the streaming buffers, and only fall
        # back to recomputing the pass-1 logits if even a minimal tile won't.
        tm = tile_m
        while tm > row_align and _footprint(tm, True) + margin > vmem_budget:
            tm -= row_align
        if _footprint(tm, True) + margin <= vmem_budget:
            mode, tile_m = "stripe", tm
        else:
            mode = "two_pass"
    if mode not in ("stripe", "two_pass"):
        raise ValueError(f"unknown mode: {mode!r}")
    use_stripe = mode == "stripe"

    num_rows = _cdiv(N, tile_m)
    vmem_needed = _footprint(tile_m, use_stripe)
    vmem_limit = int(min(max(vmem_needed + margin, 16 << 20), vmem_budget))

    # ---- grid / specs --------------------------------------------------------
    grid = (num_rows, 2, num_kv)

    def x_map(i, p, kv):
        return (i, 0)

    if use_stripe:
        # Pass 1 never touches the weights; hold their block index at the last
        # pass-0 tile so no weight DMA is issued during the emit pass.
        def w_map(i, p, kv):
            return (0, kv * (1 - p) + (num_kv - 1) * p)
    else:
        def w_map(i, p, kv):
            return (0, kv)

    # During pass 0 the output block index is pinned to (i, 0): the (not yet
    # written) output buffer is never flushed to HBM.  Pass 1 then writes each
    # (i, kv) block exactly once -> minimal N*V*4 bytes of output traffic and
    # no post-kernel normalization epilogue.
    def out_map(i, p, kv):
        return (i, p * kv)

    w_kwargs = {}
    if weight_buffering != 2:
        w_kwargs["pipeline_mode"] = pl.Buffered(weight_buffering)

    in_specs = [
        pl.BlockSpec((tile_m, d_dec), x_map),
        pl.BlockSpec((tile_m, d_lm), x_map),
        pl.BlockSpec((d_dec, tile_v), w_map, **w_kwargs),
        pl.BlockSpec((d_lm, tile_v), w_map, **w_kwargs),
        pl.BlockSpec((1, tile_v), w_map),
    ]
    out_spec = pl.BlockSpec((tile_m, tile_v), out_map)

    scratch_shapes = [pltpu.VMEM((tile_m, 1), jnp.float32),   # running max
                      pltpu.VMEM((tile_m, 1), jnp.float32)]   # running sum-exp
    if use_stripe:
        scratch_shapes.append(
            pltpu.VMEM((num_kv, tile_m, tile_v), jnp.float32))  # logits stripe

    kernel = functools.partial(_fusion_kernel, tile_v=tile_v, valid_v=valid_v)

    return pl.pallas_call(
        kernel,
        out_shape=jax.ShapeDtypeStruct((N, V), jnp.float32),
        grid_spec=pltpu.PrefetchScalarGridSpec(
            num_scalar_prefetch=0,
            grid=grid,
            in_specs=in_specs,
            out_specs=out_spec,
            scratch_shapes=scratch_shapes,
        ),
        compiler_params=pltpu.CompilerParams(
            dimension_semantics=("parallel", "arbitrary", "arbitrary"),
            vmem_limit_bytes=vmem_limit,
        ),
    )(x_dec, x_lm, w_dec, w_lm, b2d)


def _reference(decoder_hidden, lm_hidden, w_dec, b_dec, w_lm):
    dec = decoder_hidden.astype(jnp.float32)
    lm = lm_hidden.astype(jnp.float32)
    logits = (
        jnp.dot(dec, w_dec.astype(jnp.float32), precision=jax.lax.Precision.HIGHEST)
        + b_dec.astype(jnp.float32)
        + jnp.dot(lm, w_lm.astype(jnp.float32), precision=jax.lax.Precision.HIGHEST)
    )
    return jax.nn.log_softmax(logits, axis=-1)


if __name__ == "__main__":
    # Shapes implied by the forward: inputs are (batch * tlen, input_size).
    batch, tlen = 2, 8
    decoder_input_size = 64
    lm_input_size = 64
    output_size = 1024          # "vocab" size; multiple of 128 -> lane-dense

    N = batch * tlen
    key = jax.random.PRNGKey(0)
    k1, k2, k3, k4, k5 = jax.random.split(key, 5)

    # bf16-representable values so the bf16 compute path and the f32 reference
    # agree up to f32 accumulation-order noise.
    def _gen(k, shape, scale=1.0):
        v = jax.random.normal(k, shape, jnp.float32) * scale
        return v.astype(jnp.bfloat16).astype(jnp.float32)

    dec_f32 = _gen(k1, (N, decoder_input_size))
    lm_f32 = _gen(k2, (N, lm_input_size))
    w_dec_f32 = _gen(k3, (decoder_input_size, output_size), 0.05)
    b_dec = _gen(k4, (output_size,), 0.05)
    w_lm_f32 = _gen(k5, (lm_input_size, output_size), 0.05)

    ref = _reference(dec_f32, lm_f32, w_dec_f32, b_dec, w_lm_f32)

    # Cast weights/activations to bf16 ONCE (init-time prep -> the in-wrapper
    # astype is a no-op, no per-call weight copies).
    dec_bf16 = dec_f32.astype(jnp.bfloat16)
    lm_bf16 = lm_f32.astype(jnp.bfloat16)
    w_dec_bf16 = w_dec_f32.astype(jnp.bfloat16)
    w_lm_bf16 = w_lm_f32.astype(jnp.bfloat16)

    # 1) default path (auto -> VMEM-stripe, single-write in-kernel log-softmax)
    out = simple_fusion_generator(dec_bf16, lm_bf16, w_dec_bf16, b_dec, w_lm_bf16)
    jax.block_until_ready(out)
    assert out.shape == (N, output_size) and out.dtype == jnp.float32
    assert jnp.allclose(out, ref, atol=2e-3, rtol=2e-3)

    # 2) multi-vocab-tile stripe path (online LSE across 4 vocab tiles)
    out2 = simple_fusion_generator(dec_bf16, lm_bf16, w_dec_bf16, b_dec,
                                   w_lm_bf16, tile_vocab=256, mode="stripe")
    jax.block_until_ready(out2)
    assert jnp.allclose(out2, ref, atol=2e-3, rtol=2e-3)

    # 3) recompute ("two_pass") path used when the logits stripe cannot fit
    out3 = simple_fusion_generator(dec_bf16, lm_bf16, w_dec_bf16, b_dec,
                                   w_lm_bf16, tile_vocab=256, mode="two_pass")
    jax.block_until_ready(out3)
    assert jnp.allclose(out3, ref, atol=2e-3, rtol=2e-3)

    # 4) ragged rows / vocab (exercises the vocab mask + OOB-dropping writes)
    Np, Vp = 13, 1000
    ref4 = _reference(dec_f32[:Np], lm_f32[:Np], w_dec_f32[:, :Vp],
                      b_dec[:Vp], w_lm_f32[:, :Vp])
    out4 = simple_fusion_generator(dec_bf16[:Np], lm_bf16[:Np],
                                   w_dec_bf16[:, :Vp], b_dec[:Vp],
                                   w_lm_bf16[:, :Vp])
    jax.block_until_ready(out4)
    assert out4.shape == (Np, Vp)
    assert jnp.allclose(out4, ref4, atol=2e-3, rtol=2e-3)

    # 4b) ragged + multi-tile + recompute path
    out4b = simple_fusion_generator(dec_bf16[:Np], lm_bf16[:Np],
                                    w_dec_bf16[:, :Vp], b_dec[:Vp],
                                    w_lm_bf16[:, :Vp],
                                    tile_vocab=256, mode="two_pass")
    jax.block_until_ready(out4b)
    assert jnp.allclose(out4b, ref4, atol=2e-3, rtol=2e-3)

    # 5) f32-operand path (explicit opt-in; higher precision, more bandwidth)
    out5 = simple_fusion_generator(dec_f32, lm_f32, w_dec_f32, b_dec, w_lm_f32,
                                   compute_dtype=jnp.float32)
    jax.block_until_ready(out5)
    assert jnp.allclose(out5, ref, atol=2e-3, rtol=2e-3)

    print("KERNEL_OK")
</pallas_src>

<mosaic_0001>
module attributes {stable_mosaic.version = 11 : i64} {
  func.func @_fusion_kernel(%arg0: i32, %arg1: i32, %arg2: i32, %arg3: memref<16x64xbf16, #tpu.memory_space<vmem>>, %arg4: memref<16x64xbf16, #tpu.memory_space<vmem>>, %arg5: memref<64x1024xbf16, #tpu.memory_space<vmem>>, %arg6: memref<64x1024xbf16, #tpu.memory_space<vmem>>, %arg7: memref<1x1024xf32, #tpu.memory_space<vmem>>, %arg8: memref<16x1024xf32, #tpu.memory_space<vmem>>, %arg9: memref<16x1xf32, #tpu.memory_space<vmem>>, %arg10: memref<16x1xf32, #tpu.memory_space<vmem>>, %arg11: memref<1x16x1024xf32, #tpu.memory_space<vmem>>) attributes {dimension_semantics = [#tpu.dimension_semantics<parallel>, #tpu.dimension_semantics<arbitrary>, #tpu.dimension_semantics<arbitrary>], iteration_bounds = array<i64: 1, 2, 1>, scalar_prefetch = 0 : i64, scratch_operands = 3 : i64, tpu.core_type = #tpu.core_type<tc>, window_params = [{transform_indices = @transform_0, window_bounds = array<i64: 16, 64>}, {transform_indices = @transform_1, window_bounds = array<i64: 16, 64>}, {transform_indices = @transform_2, window_bounds = array<i64: 64, 1024>}, {transform_indices = @transform_3, window_bounds = array<i64: 64, 1024>}, {transform_indices = @transform_4, window_bounds = array<i64: 1, 1024>}, {transform_indices = @transform_5, window_bounds = array<i64: 16, 1024>}]} {
    %c0_i32 = arith.constant 0 : i32
    %0 = arith.cmpi eq, %arg1, %c0_i32 : i32
    %c0_i32_0 = arith.constant 0 : i32
    %1 = arith.cmpi eq, %arg2, %c0_i32_0 : i32
    %2 = arith.andi %0, %1 : i1
    %3 = arith.extui %2 : i1 to i32
    %c0_i32_1 = arith.constant 0 : i32
    %4 = arith.cmpi ne, %3, %c0_i32_1 : i32
    scf.if %4 {
      %cst = arith.constant 0xFF800000 : f32
      %11 = vector.broadcast %cst : f32 to vector<16x1xf32>
      %c0 = arith.constant 0 : index
      %c0_5 = arith.constant 0 : index
      %12 = vector.load %arg9[%c0, %c0_5] : memref<16x1xf32, #tpu.memory_space<vmem>>, vector<16x1xf32>
      tpu.vector_store %arg9[%c0, %c0_5], %11 {strides = array<i32>} : memref<16x1xf32, #tpu.memory_space<vmem>>, vector<16x1xf32>,
      %cst_6 = arith.constant 0.000000e+00 : f32
      %13 = vector.broadcast %cst_6 : f32 to vector<16x1xf32>
      %c0_7 = arith.constant 0 : index
      %c0_8 = arith.constant 0 : index
      %14 = vector.load %arg10[%c0_7, %c0_8] : memref<16x1xf32, #tpu.memory_space<vmem>>, vector<16x1xf32>
      tpu.vector_store %arg10[%c0_7, %c0_8], %13 {strides = array<i32>} : memref<16x1xf32, #tpu.memory_space<vmem>>, vector<16x1xf32>,
    } else {
    }
    %c0_i32_2 = arith.constant 0 : i32
    %5 = arith.cmpi eq, %arg1, %c0_i32_2 : i32
    %6 = arith.extui %5 : i1 to i32
    %c0_i32_3 = arith.constant 0 : i32
    %7 = arith.cmpi ne, %6, %c0_i32_3 : i32
    scf.if %7 {
      %c0 = arith.constant 0 : index
      %c0_5 = arith.constant 0 : index
      %11 = vector.load %arg3[%c0, %c0_5] : memref<16x64xbf16, #tpu.memory_space<vmem>>, vector<16x64xbf16>
      %c0_6 = arith.constant 0 : index
      %c0_7 = arith.constant 0 : index
      %12 = vector.load %arg5[%c0_6, %c0_7] : memref<64x1024xbf16, #tpu.memory_space<vmem>>, vector<64x1024xbf16>
      %cst = arith.constant dense<0.000000e+00> : vector<16x1024xf32>
      %13 = tpu.matmul %11, %12, %cst {dimension_numbers = #tpu.dot_dimension_numbers<[1], [0], [0], [1], [0, 0, 1, 1], [], []>} : vector<16x64xbf16>, vector<64x1024xbf16>, vector<16x1024xf32> -> vector<16x1024xf32>
      %c0_8 = arith.constant 0 : index
      %c0_9 = arith.constant 0 : index
      %14 = vector.load %arg4[%c0_8, %c0_9] : memref<16x64xbf16, #tpu.memory_space<vmem>>, vector<16x64xbf16>
      %c0_10 = arith.constant 0 : index
      %c0_11 = arith.constant 0 : index
      %15 = vector.load %arg6[%c0_10, %c0_11] : memref<64x1024xbf16, #tpu.memory_space<vmem>>, vector<64x1024xbf16>
      %cst_12 = arith.constant dense<0.000000e+00> : vector<16x1024xf32>
      %16 = tpu.matmul %14, %15, %cst_12 {dimension_numbers = #tpu.dot_dimension_numbers<[1], [0], [0], [1], [0, 0, 1, 1], [], []>} : vector<16x64xbf16>, vector<64x1024xbf16>, vector<16x1024xf32> -> vector<16x1024xf32>
      %17 = arith.addf %13, %16 : vector<16x1024xf32>
      %c0_13 = arith.constant 0 : index
      %c0_14 = arith.constant 0 : index
      %18 = vector.load %arg7[%c0_13, %c0_14] : memref<1x1024xf32, #tpu.memory_space<vmem>>, vector<1x1024xf32>
      %19 = vector.broadcast %18 : vector<1x1024xf32> to vector<16x1024xf32>
      %20 = arith.addf %17, %19 : vector<16x1024xf32>
      %21 = arith.index_cast %arg2 : i32 to index
      %c0_15 = arith.constant 0 : index
      %c0_16 = arith.constant 0 : index
      %22 = vector.load %arg11[%21, %c0_15, %c0_16] : memref<1x16x1024xf32, #tpu.memory_space<vmem>>, vector<1x16x1024xf32>
      %23 = vector.shape_cast %22 : vector<1x16x1024xf32> to vector<16x1024xf32>
      %24 = vector.shape_cast %20 : vector<16x1024xf32> to vector<1x16x1024xf32>
      tpu.vector_store %arg11[%21, %c0_15, %c0_16], %24 {strides = array<i32>} : memref<1x16x1024xf32, #tpu.memory_space<vmem>>, vector<1x16x1024xf32>,
      %c0_17 = arith.constant 0 : index
      %c0_18 = arith.constant 0 : index
      %25 = vector.load %arg9[%c0_17, %c0_18] : memref<16x1xf32, #tpu.memory_space<vmem>>, vector<16x1xf32>
      %cst_19 = arith.constant dense<0xFF800000> : vector<16xf32>
      %26 = vector.multi_reduction <maximumf>, %20, %cst_19 [1] : vector<16x1024xf32> to vector<16xf32>
      %27 = vector.shape_cast %26 : vector<16xf32> to vector<16x1xf32>
      %28 = arith.maximumf %25, %27 : vector<16x1xf32>
      %c0_20 = arith.constant 0 : index
      %c0_21 = arith.constant 0 : index
      %29 = vector.load %arg10[%c0_20, %c0_21] : memref<16x1xf32, #tpu.memory_space<vmem>>, vector<16x1xf32>
      %30 = arith.subf %25, %28 : vector<16x1xf32>
      %31 = math.exp %30 : vector<16x1xf32>
      %32 = arith.mulf %29, %31 : vector<16x1xf32>
      %33 = vector.broadcast %28 : vector<16x1xf32> to vector<16x1024xf32>
      %34 = arith.subf %20, %33 : vector<16x1024xf32>
      %35 = math.exp %34 : vector<16x1024xf32>
      %cst_22 = arith.constant dense<0.000000e+00> : vector<16xf32>
      %36 = vector.multi_reduction <add>, %35, %cst_22 [1] : vector<16x1024xf32> to vector<16xf32>
      %37 = vector.shape_cast %36 : vector<16xf32> to vector<16x1xf32>
      %38 = arith.addf %32, %37 : vector<16x1xf32>
      %c0_23 = arith.constant 0 : index
      %c0_24 = arith.constant 0 : index
      %39 = vector.load %arg10[%c0_23, %c0_24] : memref<16x1xf32, #tpu.memory_space<vmem>>, vector<16x1xf32>
      tpu.vector_store %arg10[%c0_23, %c0_24], %38 {strides = array<i32>} : memref<16x1xf32, #tpu.memory_space<vmem>>, vector<16x1xf32>,
      %c0_25 = arith.constant 0 : index
      %c0_26 = arith.constant 0 : index
      %40 = vector.load %arg9[%c0_25, %c0_26] : memref<16x1xf32, #tpu.memory_space<vmem>>, vector<16x1xf32>
      tpu.vector_store %arg9[%c0_25, %c0_26], %28 {strides = array<i32>} : memref<16x1xf32, #tpu.memory_space<vmem>>, vector<16x1xf32>,
    } else {
    }
    %c1_i32 = arith.constant 1 : i32
    %8 = arith.cmpi eq, %arg1, %c1_i32 : i32
    %9 = arith.extui %8 : i1 to i32
    %c0_i32_4 = arith.constant 0 : i32
    %10 = arith.cmpi ne, %9, %c0_i32_4 : i32
    scf.if %10 {
      %c0 = arith.constant 0 : index
      %c0_5 = arith.constant 0 : index
      %11 = vector.load %arg9[%c0, %c0_5] : memref<16x1xf32, #tpu.memory_space<vmem>>, vector<16x1xf32>
      %c0_6 = arith.constant 0 : index
      %c0_7 = arith.constant 0 : index
      %12 = vector.load %arg10[%c0_6, %c0_7] : memref<16x1xf32, #tpu.memory_space<vmem>>, vector<16x1xf32>
      %13 = math.log %12 : vector<16x1xf32>
      %14 = arith.addf %11, %13 : vector<16x1xf32>
      %15 = arith.index_cast %arg2 : i32 to index
      %c0_8 = arith.constant 0 : index
      %c0_9 = arith.constant 0 : index
      %16 = vector.load %arg11[%15, %c0_8, %c0_9] : memref<1x16x1024xf32, #tpu.memory_space<vmem>>, vector<1x16x1024xf32>
      %17 = vector.shape_cast %16 : vector<1x16x1024xf32> to vector<16x1024xf32>
      %18 = vector.broadcast %14 : vector<16x1xf32> to vector<16x1024xf32>
      %19 = arith.subf %17, %18 : vector<16x1024xf32>
      %c0_10 = arith.constant 0 : index
      %c0_11 = arith.constant 0 : index
      %20 = vector.load %arg8[%c0_10, %c0_11] : memref<16x1024xf32, #tpu.memory_space<vmem>>, vector<16x1024xf32>
      tpu.vector_store %arg8[%c0_10, %c0_11], %19 {strides = array<i32>} : memref<16x1024xf32, #tpu.memory_space<vmem>>, vector<16x1024xf32>,
    } else {
    }
    return
  }
  func.func @transform_0(%arg0: i32, %arg1: i32, %arg2: i32) -> (i32, i32) {
    %c0_i32 = arith.constant 0 : i32
    %c0_i32_0 = arith.constant 0 : i32
    return %arg0, %c0_i32 : i32, i32
  }
  func.func @transform_1(%arg0: i32, %arg1: i32, %arg2: i32) -> (i32, i32) {
    %c0_i32 = arith.constant 0 : i32
    %c0_i32_0 = arith.constant 0 : i32
    return %arg0, %c0_i32 : i32, i32
  }
  func.func @transform_2(%arg0: i32, %arg1: i32, %arg2: i32) -> (i32, i32) {
    %c1_i32 = arith.constant 1 : i32
    %0 = arith.subi %c1_i32, %arg1 : i32
    %1 = arith.muli %arg2, %0 : i32
    %c0_i32 = arith.constant 0 : i32
    %2 = arith.muli %c0_i32, %arg1 : i32
    %3 = arith.addi %1, %2 : i32
    %c0_i32_0 = arith.constant 0 : i32
    %c0_i32_1 = arith.constant 0 : i32
    return %c0_i32_0, %3 : i32, i32
  }
  func.func @transform_3(%arg0: i32, %arg1: i32, %arg2: i32) -> (i32, i32) {
    %c1_i32 = arith.constant 1 : i32
    %0 = arith.subi %c1_i32, %arg1 : i32
    %1 = arith.muli %arg2, %0 : i32
    %c0_i32 = arith.constant 0 : i32
    %2 = arith.muli %c0_i32, %arg1 : i32
    %3 = arith.addi %1, %2 : i32
    %c0_i32_0 = arith.constant 0 : i32
    %c0_i32_1 = arith.constant 0 : i32
    return %c0_i32_0, %3 : i32, i32
  }
  func.func @transform_4(%arg0: i32, %arg1: i32, %arg2: i32) -> (i32, i32) {
    %c1_i32 = arith.constant 1 : i32
    %0 = arith.subi %c1_i32, %arg1 : i32
    %1 = arith.muli %arg2, %0 : i32
    %c0_i32 = arith.constant 0 : i32
    %2 = arith.muli %c0_i32, %arg1 : i32
    %3 = arith.addi %1, %2 : i32
    %c0_i32_0 = arith.constant 0 : i32
    %c0_i32_1 = arith.constant 0 : i32
    return %c0_i32_0, %3 : i32, i32
  }
  func.func @transform_5(%arg0: i32, %arg1: i32, %arg2: i32) -> (i32, i32) {
    %0 = arith.muli %arg1, %arg2 : i32
    %c0_i32 = arith.constant 0 : i32
    return %arg0, %0 : i32, i32
  }
}

</mosaic_0001>

<bundles_post_ra>
// kernel: tpu_custom_call.1
= control target key start
LH: loop header
LB: loop body
LE: loop exit
PB: predicated region body
PF: predicated region fallthrough
CT: control target
= control target key end

     0   :  { %10 = vsyncpa [#allocation6], 0  ;;  %s2405_s0 = inlined_call_operand.hbm [shape: bf16[16,64], index: 0, kind: input, shape index: {}]   ;;  %s2406_s1 = inlined_call_operand.hbm [shape: bf16[16,64], index: 1, kind: input, shape index: {}]   ;;  %s2407_s2 = inlined_call_operand.hbm [shape: bf16[64,1024], index: 2, kind: input, shape index: {}]   ;;  %s2408_s3 = inlined_call_operand.hbm [shape: bf16[64,1024], index: 3, kind: input, shape index: {}]   ;;  %s2409_s4 = inlined_call_operand.vmem [shape: f32[1,1024], index: 4, kind: input, shape index: {}]   ;;  %s2410_s5 = inlined_call_operand.hbm [shape: f32[16,1024], index: 5, kind: output, shape index: {}]  }
   0x1   :  { %11 = vsyncpa [#allocation9], 0 }
   0x2   :  { %12 = vsyncpa [#allocation7], 0 }
   0x3   :  { %14 = vsyncpa [#allocation7 + $0x1], 0  ;;  %s2063_s18 = smov 0   ;;  %s2065_s19 = smov 0  }
   0x4   :  { %s2067_s20 = smov 0  }
   0x5 LB: > { %s2079_s21 = sadd.s32 4294967295, %s2016_s20   ;;  %s35_s23 = sadd.s32 1, %s2012_s19  ;;  %s2016_s20 = sphi %s2067_s20, %s20_s20   ;;  %s2012_s19 = sphi %s2065_s19, %s2440_s19   ;;  %s2008_s18 = sphi %s2063_s18, %s2439_s18  }
   0x6   : > { %p1596_p0 = scmp.ge.s32.totalorder %s2016_s20, 1  ;;  %p37_p1 = scmp.ge.s32.totalorder %s35_s23, 2 }
   0x7   : > { %p216_p2 = scmp.lt.s32.totalorder %s2016_s20, 3  ;;  %p2411_p3 = scmp.eq.s32.totalorder %s2079_s21, 0 }
   0x8   : > { %s2442_s23 = smov (%p37_p1, %s35_s23), 0  ;;  %s2018_s25 = smov [#allocation5]  }
   0x9   : > { %p2088_p4 = pnand %p1596_p0, %p216_p2  ;;  %s231_s26 = sshll.u32 %s2018_s25, 4  ;;  %s232_s26 = int_to_ptr.vmem [resolvable:$true] %s231_s26 }
   0xa   : > { %s261_s28 = sand.u32 1, %s2016_s20   ;;  %s1840_s6 = scalar_lea.hbm %s2405_s0, 128 }
   0xb   : > { %s2419_s24 = scalar_select %p2088_p4, 1, 0 }
   0xc   : > { %p1726_p5 = pneg %p2088_p4  ;;  %p1841_p10 = scmp.ne.s32.totalorder %s2405_s0, %s1840_s6 }
   0xd   : > { %p1847_p0 = scmp.lt.u32.totalorder %s1840_s6, %s2405_s0 }
   0xe   : > { %p2097_p7 = pnand %p2411_p3, %p1726_p5 }
  0x10   : > { %s2420_s27 = scalar_select %p2097_p7, 1, 0 }
  0x11   : > { %p2413_p11 = pneg %p2097_p7 }
  0x13   : > { %p1843_p12 = pnand %p2413_p11, %p1841_p10 }
  0x15   : > { %p1844_p13 = pneg %p1843_p12 }
  0x17   : > { %p1849_p1 = pnand %p1847_p0, %p1844_p13 }
  0x19   : > { %1852 = shalt.err (!%p1849_p1)
}
  0x1a   : > { %s1853_s11 = scalar_lea.vmem %s232_s26, 128  ;;  %p1861_p3 = scmp.lt.s32.totalorder %s232_s26, %s232_s26 }
  0x1b   : > { %p1854_p2 = scmp.ne.s32.totalorder %s232_s26, %s1853_s11  ;;  %p1862_p9 = scmp.lt.s32.totalorder %s1853_s11, %s1853_s11 }
  0x1d   : > { %p1856_p5 = pnand %p1854_p2, %p2413_p11  ;;  %p1863_p8 = por %p1862_p9, %p1861_p3 }
  0x1f   : > { %p1857_p6 = pneg %p1856_p5 }
  0x21   : > { %p1864_p4 = pnand %p1863_p8, %p1857_p6 }
  0x23   : > { %1867 = shalt.err (!%p1864_p4)
}
  0x24   : > { %s2019_s12 = smov 64   ;;  %s2020_s13 = smov 4  }
  0x25   : > { %1729 = dma.hbm_to_vmem [thread:$0]  (!%p2097_p7), %s2405_s0, 128, %s232_s26, [#allocation6], %s2019_s12, %s2019_s12, %s2020_s13  }
  0x26   : > { %s2021_s16 = smov [#allocation10]   ;;  %p2421_p10 = scmp.lt.s32.totalorder %s2016_s20, 2 }
  0x27   : > { %s274_s17 = sshll.u32 %s2021_s16, 4  ;;  %p2422_p12 = scmp.eq.s32.totalorder %s2016_s20, 0  ;;  %s275_s17 = int_to_ptr.vmem [resolvable:$true] %s274_s17 }
  0x28   : > { %s2137_s29 = scalar_lea.sflag [#allocation6], %s261_s28  ;;  %s1868_s7 = scalar_lea.hbm %s2407_s2, 4096 }
  0x29   : > { %p2133_p3 = pnand %p2422_p12, %p2421_p10  ;;  %p1869_p4 = scmp.ne.s32.totalorder %s2407_s2, %s1868_s7 }
  0x2a   : > { %p1875_p13 = scmp.lt.u32.totalorder %s1868_s7, %s2407_s2 }
  0x2b   : > { %s2423_s25 = scalar_select %p2133_p3, 1, 0 }
  0x2c   : > { %p2416_p6 = pneg %p2133_p3 }
  0x2e   : > { %p1871_p8 = pnand %p2416_p6, %p1869_p4 }
  0x30   : > { %p1872_p9 = pneg %p1871_p8 }
  0x32   : > { %p1877_p0 = pnand %p1875_p13, %p1872_p9 }
  0x34   : > { %1880 = shalt.err (!%p1877_p0)
}
  0x35   : > { %s1881_s28 = scalar_lea.vmem %s275_s17, 4096  ;;  %s1888_s11 = scalar_lea.vmem %s275_s17, 8192 }
  0x36   : > { %p1882_p1 = scmp.ne.s32.totalorder %s275_s17, %s1881_s28  ;;  %p1889_p10 = scmp.lt.s32.totalorder %s275_s17, %s275_s17 }
  0x37   : > { %p1890_p12 = scmp.lt.s32.totalorder %s1888_s11, %s1881_s28 }
  0x38   : > { %p1884_p2 = pnand %p1882_p1, %p2416_p6 }
  0x39   : > { %p1891_p11 = por %p1890_p12, %p1889_p10 }
  0x3a   : > { %p1885_p5 = pneg %p1884_p2 }
  0x3c   : > { %p1892_p7 = pnand %p1891_p11, %p1885_p5 }
  0x3e   : > { %1895 = shalt.err (!%p1892_p7)
}
  0x3f   : > { %s2022_s14 = smov 512   ;;  %s2023_s15 = smov 32  }
  0x40   : > { %1736 = dma.hbm_to_vmem [thread:$0]  (!%p2133_p3), %s2407_s2, 4096, %s275_s17, %s2137_s29, %s2022_s14, %s2022_s14, %s2023_s15  }
  0x41   : > { %s2024_s6 = smov [#allocation8]   ;;  %s2025_s8 = smov [#allocation11]  }
  0x42   : > { %s247_s7 = sshll.u32 %s2024_s6, 4  ;;  %s297_s9 = sshll.u32 %s2025_s8, 4  ;;  %s248_s7 = int_to_ptr.vmem [resolvable:$true] %s247_s7  ;;  %s2165_s9 = int_to_ptr.vmem [resolvable:$true] %s297_s9 }
  0x43   : > { %s1896_s28 = scalar_lea.hbm %s2406_s1, 128  ;;  %p2424_p11 = scmp.ne.s32.totalorder %s2420_s27, 0 }
  0x44   : > { %p1897_p7 = scmp.ne.s32.totalorder %s2406_s1, %s1896_s28  ;;  %p1903_p13 = scmp.lt.u32.totalorder %s1896_s28, %s2406_s1 }
  0x45   : > { %p2425_p4 = pneg %p2424_p11 }
  0x47   : > { %p1899_p8 = pnand %p1897_p7, %p2425_p4 }
  0x49   : > { %p1900_p9 = pneg %p1899_p8 }
  0x4b   : > { %p1905_p0 = pnand %p1903_p13, %p1900_p9 }
  0x4d   : > { %1908 = shalt.err (!%p1905_p0)
}
  0x4e   : > { %s1909_s30 = scalar_lea.vmem %s248_s7, 128  ;;  %p2426_p2 = pmov %p2425_p4 }
  0x4f   : > { %p1910_p1 = scmp.ne.s32.totalorder %s248_s7, %s1909_s30  ;;  %p1917_p12 = scmp.lt.s32.totalorder %s248_s7, %s248_s7 }
  0x50   : > { %p1918_p6 = scmp.lt.s32.totalorder %s1909_s30, %s1909_s30 }
  0x51   : > { %p1912_p5 = pnand %p1910_p1, %p2426_p2 }
  0x52   : > { %p1919_p3 = por %p1918_p6, %p1917_p12 }
  0x53   : > { %p1913_p10 = pneg %p1912_p5 }
  0x55   : > { %p1920_p4 = pnand %p1919_p3, %p1913_p10 }
  0x57   : > { %1923 = shalt.err (!%p1920_p4)
}
  0x58   : > { %1732 = dma.hbm_to_vmem [thread:$0]  (!%p2424_p11), %s2406_s1, 128, %s248_s7, [#allocation9], %s2019_s12, %s2019_s12, %s2020_s13  }
  0x59   : > { %s1924_s10 = scalar_lea.hbm %s2408_s3, 4096  ;;  %p2427_p3 = scmp.ne.s32.totalorder %s2423_s25, 0 }
  0x5a   : > { %p1925_p6 = scmp.ne.s32.totalorder %s2408_s3, %s1924_s10  ;;  %p1931_p13 = scmp.lt.u32.totalorder %s1924_s10, %s2408_s3 }
  0x5b   : > { %p2428_p7 = pneg %p2427_p3 }
  0x5d   : > { %p1927_p8 = pnand %p1925_p6, %p2428_p7 }
  0x5f   : > { %p1928_p9 = pneg %p1927_p8 }
  0x61   : > { %p1933_p0 = pnand %p1931_p13, %p1928_p9 }
  0x63   : > { %1936 = shalt.err (!%p1933_p0)
}
  0x64   : > { %s1937_s12 = scalar_lea.vmem %s2165_s9, 4096  ;;  %p2429_p1 = pmov %p2428_p7 }
  0x65   : > { %p1938_p11 = scmp.ne.s32.totalorder %s2165_s9, %s1937_s12  ;;  %s1944_s13 = scalar_lea.vmem %s2165_s9, 8192 }
  0x66   : > { %p1945_p10 = scmp.lt.s32.totalorder %s2165_s9, %s2165_s9  ;;  %p1946_p12 = scmp.lt.s32.totalorder %s1944_s13, %s1937_s12 }
  0x67   : > { %p1940_p2 = pnand %p1938_p11, %p2429_p1 }
  0x68   : > { %p1947_p4 = por %p1946_p12, %p1945_p10 }
  0x69   : > { %p1941_p5 = pneg %p1940_p2 }
  0x6b   : > { %p1948_p6 = pnand %p1947_p4, %p1941_p5 }
  0x6d   : > { %1951 = shalt.err (!%p1948_p6)
}
  0x6e   : > { %1739 = dma.hbm_to_vmem [thread:$0]  (!%p2427_p3), %s2408_s3, 4096, %s2165_s9, %s2137_s29, %s2022_s14, %s2022_s14, %s2023_s15  }
  0x6f   : > { %p2430_p7 = scmp.ne.s32.totalorder %s2419_s24, 0 }
  0x70   : > { %p2431_p8 = scmp.eq.s32.totalorder (!%p2430_p7), %s2079_s21, 0 }
  0x71   : > { %321 = sbr.rel (%p2430_p7) target bundleno = 1059 (0x423), region = 40 }
  0x78   : > { %1991 = dma.done.wait (%p2431_p8), [#allocation6], 128   ;;  %p2432_p9 = pmov %p2431_p8 }
  0x79   : > { %p2433_p13 = pmov %p2431_p8 }
  0x7a   : > { %1993 = vsyncadd (%p2432_p9), [#allocation6], 4294967168 }
  0x7b   : > { %1995 = dma.done.wait (%p2433_p13), [#allocation9], 128   ;;  %p2434_p0 = pmov %p2431_p8 }
  0x7c   : > { %s331_s25 = sand.u32 1, %s2079_s21  }
  0x7d   : > { %1997 = vsyncadd (%p2434_p0), [#allocation9], 4294967168  ;;  %s332_s30 = scalar_lea.sflag [#allocation6], %s331_s25  ;;  %p2435_p3 = pmov %p2434_p0 }
  0x7e   : > { %p2436_p11 = pmov %p2434_p0 }
  0x7f   : > { %1999 = dma.done.wait (%p2435_p3), %s332_s30, 8192  }
  0x80   : > { %2001 = vsyncadd (%p2436_p11), %s332_s30, 4294959104  ;;  %p403_p1 = scmp.eq.s32.totalorder %s2008_s18, 0 }
  0x81   : > { %vm409_vm0 = vcmask (%p403_p1), 7168   ;;  %v2026_v0 = vmov (%p403_p1), -inf   ;;  %v2027_v1 = vmov (%p403_p1), 0.0  }
  0x82   : > { %408 = sbr.rel (!%p403_p1) target bundleno = 137 (0x89), region = 60  ;;  %410 = vst.msk [vmem:[#allocation2] sm:$0xff] (%p403_p1), %vm409_vm0, %v2026_v0  ;;  %411 = vst.msk [vmem:[#allocation2 + $0x8] sm:$0xff] (%p403_p1), %vm409_vm0, %v2026_v0 }
  0x83   : > { %412 = vst.msk [vmem:[#allocation3] sm:$0xff] (%p403_p1), %vm409_vm0, %v2027_v1  ;;  %413 = vst.msk [vmem:[#allocation3 + $0x8] sm:$0xff] (%p403_p1), %vm409_vm0, %v2027_v1 }
  0x89 PF: > { %p1609_p2 = scmp.ne.s32.totalorder %s2008_s18, 0 }
  0x8a   : > { %v453_v2 = vld [vmem:[#allocation11] sm:$0xff] (!%p1609_p2)  ;;  %v454_v4 = vld [vmem:[#allocation11 + $0x8] sm:$0xff] (!%p1609_p2)  ;;  %v2028_v10 = vmov (!%p1609_p2), 0   ;;  %v455_v33 = vld [vmem:[#allocation11 + $0x10] sm:$0xff] (!%p1609_p2)  ;;  %vm650_vm1 = vcmask (!%p1609_p2), 523264   ;;  %vm1353_vm2 = vcmask (!%p1609_p2), 7168  }
  0x8b   : > { %416 = sbr.rel (%p1609_p2) target bundleno = 879 (0x36f), region = 64  ;;  %v457_v3 = vld [vmem:[#allocation11 + $0x20] sm:$0xff] (!%p1609_p2)  ;;  %v458_v6 = vld [vmem:[#allocation11 + $0x28] sm:$0xff] (!%p1609_p2)  ;;  %686 = vmatprep.mubr.bf16.mxu0 (!%p1609_p2), %v2028_v10  ;;  %729 = vmatprep.mubr.bf16.mxu1 (!%p1609_p2), %v2028_v10  ;;  %v459_v34 = vld [vmem:[#allocation11 + $0x30] sm:$0xff] (!%p1609_p2) }
  0x8c   : > { %v1612_v5 = vcombine.high (!%p1609_p2), %v453_v2, %v457_v3  ;;  %v1611_v7 = vcombine.low (!%p1609_p2), %v453_v2, %v457_v3  ;;  %v461_v8 = vld [vmem:[#allocation11 + $0x40] sm:$0xff] (!%p1609_p2)  ;;  %v1614_v11 = vcombine.high (!%p1609_p2), %v454_v4, %v458_v6  ;;  %v1613_v12 = vcombine.low (!%p1609_p2), %v454_v4, %v458_v6  ;;  %v462_v14 = vld [vmem:[#allocation11 + $0x48] sm:$0xff] (!%p1609_p2)  ;;  %1795 = vset.pattern.permute.xlu1 (!%p1609_p2), %v2028_v10  ;;  %v456_v35 = vld [vmem:[#allocation11 + $0x18] sm:$0xff] (!%p1609_p2) }
  0x8d   : > { %v465_v9 = vld [vmem:[#allocation11 + $0x60] sm:$0xff] (!%p1609_p2)  ;;  %v466_v15 = vld [vmem:[#allocation11 + $0x68] sm:$0xff] (!%p1609_p2)  ;;  %1796 = vset.pattern.permute.xlu0 (!%p1609_p2), %v2028_v10  ;;  %v460_v36 = vld [vmem:[#allocation11 + $0x38] sm:$0xff] (!%p1609_p2)  ;;  %v1616_v39 = vcombine.high (!%p1609_p2), %v455_v33, %v459_v34  ;;  %v1615_v46 = vcombine.low (!%p1609_p2), %v455_v33, %v459_v34 }
  0x8e   : > { %v1620_v13 = vcombine.high (!%p1609_p2), %v461_v8, %v465_v9  ;;  %v469_v16 = vld [vmem:[#allocation11 + $0x80] sm:$0xff] (!%p1609_p2)  ;;  %654 = vmatprep.subr.bf16.mxu0 (!%p1609_p2), %v1612_v5  ;;  %v1622_v17 = vcombine.high (!%p1609_p2), %v462_v14, %v466_v15  ;;  %v470_v19 = vld [vmem:[#allocation11 + $0x88] sm:$0xff] (!%p1609_p2)  ;;  %697 = vmatprep.subr.bf16.mxu1 (!%p1609_p2), %v1614_v11  ;;  %v1619_v21 = vcombine.low (!%p1609_p2), %v461_v8, %v465_v9  ;;  %v463_v41 = vld [vmem:[#allocation11 + $0x50] sm:$0xff] (!%p1609_p2) }
  0x8f   : > { %v473_v18 = vld [vmem:[#allocation11 + $0xa0] sm:$0xff] (!%p1609_p2)  ;;  %v474_v20 = vld [vmem:[#allocation11 + $0xa8] sm:$0xff] (!%p1609_p2)  ;;  %655 = vmatpush1.bf16.msra.mxu0 (!%p1609_p2), %v1611_v7  ;;  %698 = vmatpush1.bf16.msra.mxu1 (!%p1609_p2), %v1613_v12  ;;  %v1621_v22 = vcombine.low (!%p1609_p2), %v462_v14, %v466_v15  ;;  %v1618_v40 = vcombine.high (!%p1609_p2), %v456_v35, %v460_v36  ;;  %v467_v42 = vld [vmem:[#allocation11 + $0x70] sm:$0xff] (!%p1609_p2)  ;;  %v1617_v47 = vcombine.low (!%p1609_p2), %v456_v35, %v460_v36 }
  0x90   : > { %656 = vmatprep.subr.bf16.mxu0 (!%p1609_p2), %v1620_v13  ;;  %v1628_v23 = vcombine.high (!%p1609_p2), %v469_v16, %v473_v18  ;;  %699 = vmatprep.subr.bf16.mxu1 (!%p1609_p2), %v1622_v17  ;;  %v1630_v24 = vcombine.high (!%p1609_p2), %v470_v19, %v474_v20  ;;  %v477_v25 = vld [vmem:[#allocation11 + $0xc0] sm:$0xff] (!%p1609_p2)  ;;  %v478_v27 = vld [vmem:[#allocation11 + $0xc8] sm:$0xff] (!%p1609_p2)  ;;  %v1627_v29 = vcombine.low (!%p1609_p2), %v469_v16, %v473_v18  ;;  %v2241_v43 = vld [vmem:[#allocation8] sm:$0xff] (!%p1609_p2)  }
  0x91   : > { %v481_v26 = vld [vmem:[#allocation11 + $0xe0] sm:$0xff] (!%p1609_p2)  ;;  %v482_v28 = vld [vmem:[#allocation11 + $0xe8] sm:$0xff] (!%p1609_p2)  ;;  %v1629_v30 = vcombine.low (!%p1609_p2), %v470_v19, %v474_v20  ;;  %v464_v44 = vld [vmem:[#allocation11 + $0x58] sm:$0xff] (!%p1609_p2)  ;;  %v1624_v48 = vcombine.high (!%p1609_p2), %v463_v41, %v467_v42  ;;  %v1623_v54 = vcombine.low (!%p1609_p2), %v463_v41, %v467_v42 }
  0x92   : > { %v1636_v31 = vcombine.high %v477_v25, %v481_v26  ;;  %v1638_v32 = vcombine.high %v478_v27, %v482_v28  ;;  %v1635_v37 = vcombine.low %v477_v25, %v481_v26  ;;  %v1637_v38 = vcombine.low %v478_v27, %v482_v28  ;;  %v468_v45 = vld [vmem:[#allocation11 + $0x78] sm:$0xff]  ;;  %v471_v50 = vld [vmem:[#allocation11 + $0x90] sm:$0xff]  ;;  %v419_v2 = vld [vmem:[#allocation10] sm:$0xff] }
  0x93   : > { %657 = vmatpush1.bf16.msra.mxu0 %v1619_v21  ;;  %700 = vmatpush1.bf16.msra.mxu1 %v1621_v22  ;;  %v1626_v49 = vcombine.high %v464_v44, %v468_v45  ;;  %v475_v51 = vld [vmem:[#allocation11 + $0xb0] sm:$0xff]  ;;  %v472_v52 = vld [vmem:[#allocation11 + $0x98] sm:$0xff]  ;;  %v1625_v55 = vcombine.low %v464_v44, %v468_v45  ;;  %v423_v3 = vld [vmem:[#allocation10 + $0x20] sm:$0xff] }
  0x94   : > { %658 = vmatprep.subr.bf16.mxu0 %v1628_v23  ;;  %701 = vmatprep.subr.bf16.mxu1 %v1630_v24  ;;  %v476_v53 = vld [vmem:[#allocation11 + $0xb8] sm:$0xff]  ;;  %v1632_v56 = vcombine.high %v471_v50, %v475_v51  ;;  %v479_v58 = vld [vmem:[#allocation11 + $0xd0] sm:$0xff]  ;;  %v1631_v62 = vcombine.low %v471_v50, %v475_v51  ;;  %v420_v4 = vld [vmem:[#allocation10 + $0x8] sm:$0xff]  ;;  %v1649_v8 = vcombine.high %v419_v2, %v423_v3 }
  0x95   : > { %v1634_v57 = vcombine.high %v472_v52, %v476_v53  ;;  %v483_v59 = vld [vmem:[#allocation11 + $0xf0] sm:$0xff]  ;;  %v480_v60 = vld [vmem:[#allocation11 + $0xd8] sm:$0xff]  ;;  %v1633_v63 = vcombine.low %v472_v52, %v476_v53  ;;  %v424_v5 = vld [vmem:[#allocation10 + $0x28] sm:$0xff]  ;;  %v1648_v15 = vcombine.low %v419_v2, %v423_v3 }
  0x96   : > { %v484_v61 = vld [vmem:[#allocation11 + $0xf8] sm:$0xff]  ;;  %v1640_v0 = vcombine.high %v479_v58, %v483_v59  ;;  %v1639_v6 = vcombine.low %v479_v58, %v483_v59  ;;  %v1651_v9 = vcombine.high %v420_v4, %v424_v5  ;;  %v427_v11 = vld [vmem:[#allocation10 + $0x40] sm:$0xff]  ;;  %v428_v13 = vld [vmem:[#allocation10 + $0x48] sm:$0xff]  ;;  %v1650_v16 = vcombine.low %v420_v4, %v424_v5 }
  0x97   : > { %659 = vmatpush1.bf16.msra.mxu0 %v1627_v29  ;;  %702 = vmatpush1.bf16.msra.mxu1 %v1629_v30  ;;  %v1642_v1 = vcombine.high %v480_v60, %v484_v61  ;;  %v1641_v7 = vcombine.low %v480_v60, %v484_v61  ;;  %v431_v12 = vld [vmem:[#allocation10 + $0x60] sm:$0xff]  ;;  %v432_v14 = vld [vmem:[#allocation10 + $0x68] sm:$0xff]  ;;  %v421_v35 = vld [vmem:[#allocation10 + $0x10] sm:$0xff] }
  0x98   : > { %660 = vmatprep.subr.bf16.mxu0 %v1636_v31  ;;  %703 = vmatprep.subr.bf16.mxu1 %v1638_v32  ;;  %v1657_v17 = vcombine.high %v427_v11, %v431_v12  ;;  %v1659_v18 = vcombine.high %v428_v13, %v432_v14  ;;  %v435_v19 = vld [vmem:[#allocation10 + $0x80] sm:$0xff]  ;;  %v436_v21 = vld [vmem:[#allocation10 + $0x88] sm:$0xff]  ;;  %v1656_v23 = vcombine.low %v427_v11, %v431_v12  ;;  %v425_v36 = vld [vmem:[#allocation10 + $0x30] sm:$0xff] }
  0x99   : > { %v439_v20 = vld [vmem:[#allocation10 + $0xa0] sm:$0xff]  ;;  %v440_v22 = vld [vmem:[#allocation10 + $0xa8] sm:$0xff]  ;;  %v1658_v24 = vcombine.low %v428_v13, %v432_v14  ;;  %v1653_v41 = vcombine.high %v421_v35, %v425_v36  ;;  %v433_v44 = vld [vmem:[#allocation10 + $0x70] sm:$0xff] }
  0x9a   : > { %v1665_v25 = vcombine.high %v435_v19, %v439_v20  ;;  %v1667_v26 = vcombine.high %v436_v21, %v440_v22  ;;  %v443_v27 = vld [vmem:[#allocation10 + $0xc0] sm:$0xff]  ;;  %v444_v29 = vld [vmem:[#allocation10 + $0xc8] sm:$0xff]  ;;  %v1664_v31 = vcombine.low %v435_v19, %v439_v20  ;;  %v1666_v32 = vcombine.low %v436_v21, %v440_v22  ;;  %v1798_v45 = vld [vmem:[#allocation5] sm:$0xff]  }
  0x9b   : > { %661 = vmatpush1.bf16.msra.mxu0 %v1635_v37  ;;  %704 = vmatpush1.bf16.msra.mxu1 %v1637_v38  ;;  %v447_v28 = vld [vmem:[#allocation10 + $0xe0] sm:$0xff]  ;;  %v448_v30 = vld [vmem:[#allocation10 + $0xe8] sm:$0xff]  ;;  %v422_v37 = vld [vmem:[#allocation10 + $0x18] sm:$0xff] }
  0x9c   : > { %740 = vmatprep.subr.bf16.mxu0 %v1616_v39  ;;  %783 = vmatprep.subr.bf16.mxu1 %v1618_v40  ;;  %v1673_v33 = vcombine.high %v443_v27, %v447_v28  ;;  %v1675_v34 = vcombine.high %v444_v29, %v448_v30  ;;  %v426_v38 = vld [vmem:[#allocation10 + $0x38] sm:$0xff]  ;;  %v1672_v39 = vcombine.low %v443_v27, %v447_v28  ;;  %v437_v52 = vld [vmem:[#allocation10 + $0x90] sm:$0xff] }
  0x9d   : > { %v1674_v40 = vcombine.low %v444_v29, %v448_v30  ;;  %v1655_v42 = vcombine.high %v422_v37, %v426_v38  ;;  %v441_v53 = vld [vmem:[#allocation10 + $0xb0] sm:$0xff] }
  0x9e   : > { %1643 = vmatmul.mubr.msk.bf16.vlgmr.msra.gmra.mrb[0].mxu0 %vm650_vm1, %v2241_v43  ;;  %1644 = vmatmul.mubr.msk.bf16.vlgmr.msra.gmra.mrb[0].mxu1 %vm650_vm1, %v2241_v43  ;;  %v1669_v58 = vcombine.high %v437_v52, %v441_v53  ;;  %v445_v60 = vld [vmem:[#allocation10 + $0xd0] sm:$0xff] }
  0x9f   : > { %741 = vmatpush1.bf16.msra.mxu0 %v1615_v46  ;;  %784 = vmatpush1.bf16.msra.mxu1 %v1617_v47  ;;  %v430_v46 = vld [vmem:[#allocation10 + $0x58] sm:$0xff]  ;;  %v449_v61 = vld [vmem:[#allocation10 + $0xf0] sm:$0xff] }
  0xa0   : > { %742 = vmatprep.subr.bf16.mxu0 %v1624_v48  ;;  %785 = vmatprep.subr.bf16.mxu1 %v1626_v49  ;;  %v434_v47 = vld [vmem:[#allocation10 + $0x78] sm:$0xff]  ;;  %v1652_v48 = vcombine.low %v421_v35, %v425_v36  ;;  %v1654_v49 = vcombine.low %v422_v37, %v426_v38  ;;  %v1677_v2 = vcombine.high %v445_v60, %v449_v61 }
  0xa1   : > { %772 = vmatprep.mubr.bf16.mxu0 %v2028_v10  ;;  %815 = vmatprep.mubr.bf16.mxu1 %v2028_v10  ;;  %v1663_v51 = vcombine.high %v430_v46, %v434_v47  ;;  %v1676_v4 = vcombine.low %v445_v60, %v449_v61 }
  0xa3   : > { %743 = vmatpush1.bf16.msra.mxu0 %v1623_v54  ;;  %786 = vmatpush1.bf16.msra.mxu1 %v1625_v55  ;;  %v438_v54 = vld [vmem:[#allocation10 + $0x98] sm:$0xff] }
  0xa4   : > { %744 = vmatprep.subr.bf16.mxu0 %v1632_v56  ;;  %787 = vmatprep.subr.bf16.mxu1 %v1634_v57  ;;  %v442_v55 = vld [vmem:[#allocation10 + $0xb8] sm:$0xff]  ;;  %v1662_v57 = vcombine.low %v430_v46, %v434_v47 }
  0xa5   : > { %v1671_v59 = vcombine.high %v438_v54, %v442_v55 }
  0xa7   : > { %745 = vmatpush1.bf16.msra.mxu0 %v1631_v62  ;;  %788 = vmatpush1.bf16.msra.mxu1 %v1633_v63  ;;  %v446_v62 = vld [vmem:[#allocation10 + $0xd8] sm:$0xff] }
  0xa8   : > { %746 = vmatprep.subr.bf16.mxu0 %v1640_v0  ;;  %789 = vmatprep.subr.bf16.mxu1 %v1642_v1  ;;  %v450_v63 = vld [vmem:[#allocation10 + $0xf8] sm:$0xff]  ;;  %v1668_v0 = vcombine.low %v437_v52, %v441_v53  ;;  %v1670_v1 = vcombine.low %v438_v54, %v442_v55 }
  0xa9   : > { %v1679_v3 = vcombine.high %v446_v62, %v450_v63  ;;  %v1678_v5 = vcombine.low %v446_v62, %v450_v63 }
  0xab   : > { %747 = vmatpush1.bf16.msra.mxu0 %v1639_v6  ;;  %790 = vmatpush1.bf16.msra.mxu1 %v1641_v7 }
  0xac   : > { %994 = vmatprep.subr.bf16.mxu0 %v1649_v8  ;;  %1037 = vmatprep.subr.bf16.mxu1 %v1651_v9  ;;  %v1166_v8 = vld [vmem:[%s2409_s4] sm:$0xff] }
  0xae   : > { %1645 = vmatmul.mubr.msk.bf16.vlgmr.msra.gmra.mrb[4].mxu0 %vm650_vm1, %v2241_v43  ;;  %1646 = vmatmul.mubr.msk.bf16.vlgmr.msra.gmra.mrb[4].mxu1 %vm650_vm1, %v2241_v43  ;;  %v429_v43 = vld [vmem:[#allocation10 + $0x50] sm:$0xff] }
  0xaf   : > { %995 = vmatpush1.bf16.msra.mxu0 %v1648_v15  ;;  %1038 = vmatpush1.bf16.msra.mxu1 %v1650_v16  ;;  %v1661_v50 = vcombine.high %v429_v43, %v433_v44  ;;  %v1660_v56 = vcombine.low %v429_v43, %v433_v44 }
  0xb0   : > { %996 = vmatprep.subr.bf16.mxu0 %v1657_v17  ;;  %1039 = vmatprep.subr.bf16.mxu1 %v1659_v18 }
  0xb1   : > { %1026 = vmatprep.mubr.bf16.mxu0 %v2028_v10  ;;  %1069 = vmatprep.mubr.bf16.mxu1 %v2028_v10 }
  0xb3   : > { %997 = vmatpush1.bf16.msra.mxu0 %v1656_v23  ;;  %1040 = vmatpush1.bf16.msra.mxu1 %v1658_v24 }
  0xb4   : > { %998 = vmatprep.subr.bf16.mxu0 %v1665_v25  ;;  %1041 = vmatprep.subr.bf16.mxu1 %v1667_v26 }
  0xb7   : > { %999 = vmatpush1.bf16.msra.mxu0 %v1664_v31  ;;  %1042 = vmatpush1.bf16.msra.mxu1 %v1666_v32 }
  0xb8   : > { %1000 = vmatprep.subr.bf16.mxu0 %v1673_v33  ;;  %1043 = vmatprep.subr.bf16.mxu1 %v1675_v34 }
  0xbb   : > { %1001 = vmatpush1.bf16.msra.mxu0 %v1672_v39  ;;  %1044 = vmatpush1.bf16.msra.mxu1 %v1674_v40 }
  0xbc   : > { %1080 = vmatprep.subr.bf16.mxu0 %v1653_v41  ;;  %1123 = vmatprep.subr.bf16.mxu1 %v1655_v42 }
  0xbe   : > { %1680 = vmatmul.mubr.msk.bf16.vlgmr.msra.gmra.mrb[0].mxu0 %vm650_vm1, %v1798_v45  ;;  %1681 = vmatmul.mubr.msk.bf16.vlgmr.msra.gmra.mrb[0].mxu1 %vm650_vm1, %v1798_v45 }
  0xbf   : > { %1081 = vmatpush1.bf16.msra.mxu0 %v1652_v48  ;;  %1124 = vmatpush1.bf16.msra.mxu1 %v1654_v49 }
  0xc0   : > { %1082 = vmatprep.subr.bf16.mxu0 %v1661_v50  ;;  %1125 = vmatprep.subr.bf16.mxu1 %v1663_v51 }
  0xc1   : > { %1112 = vmatprep.mubr.bf16.mxu0 %v2028_v10  ;;  %1155 = vmatprep.mubr.bf16.mxu1 %v2028_v10  ;;  %v1168_v10 = vlaneseq }
  0xc3   : > { %1083 = vmatpush1.bf16.msra.mxu0 %v1660_v56  ;;  %1126 = vmatpush1.bf16.msra.mxu1 %v1662_v57  ;;  %v1169_v6 = vshrl.u32 %v1168_v10, 7 }
  0xc4   : > { %1084 = vmatprep.subr.bf16.mxu0 %v1669_v58  ;;  %1127 = vmatprep.subr.bf16.mxu1 %v1671_v59 }
  0xc5   : > { %v1170_v7 = vsub.s32 0, %v1169_v6  ;;  %v1178_v9 = vsub.s32 2, %v1169_v6  ;;  %v1174_v11 = vsub.s32 1, %v1169_v6  ;;  %v1182_v12 = vsub.s32 3, %v1169_v6 }
  0xc6   : > { %v1186_v33 = vsub.s32 4, %v1169_v6  ;;  %v1194_v34 = vsub.s32 6, %v1169_v6  ;;  %v1190_v35 = vsub.s32 5, %v1169_v6  ;;  %v1198_v36 = vsub.s32 7, %v1169_v6  ;;  %v2328_v6 = vld [vmem:[#allocation2] sm:$0xff] }
  0xc7   : > { %1085 = vmatpush1.bf16.msra.mxu0 %v1668_v0  ;;  %1128 = vmatpush1.bf16.msra.mxu1 %v1670_v1  ;;  %v1171_v13 = vrot.slane %v1166_v8, %v1170_v7  ;;  %v1179_v14 = vrot.slane %v1166_v8, %v1178_v9  ;;  %v1175_v15 = vrot.slane %v1166_v8, %v1174_v11  ;;  %v2333_v9 = vld [vmem:[#allocation2 + $0x8] sm:$0xff] }
  0xc8   : > { %1086 = vmatprep.subr.bf16.mxu0 %v1677_v2  ;;  %1129 = vmatprep.subr.bf16.mxu1 %v1679_v3  ;;  %v1183_v16 = vrot.slane %v1166_v8, %v1182_v12  ;;  %v1187_v37 = vrot.slane %v1166_v8, %v1186_v33  ;;  %v1195_v38 = vrot.slane %v1166_v8, %v1194_v34 }
  0xc9   : > { %v1191_v39 = vrot.slane %v1166_v8, %v1190_v35  ;;  %v1199_v40 = vrot.slane %v1166_v8, %v1198_v36 }
  0xcb   : > { %1087 = vmatpush1.bf16.msra.mxu0 %v1676_v4  ;;  %1130 = vmatpush1.bf16.msra.mxu1 %v1678_v5 }
  0xce   : > { %1682 = vmatmul.mubr.msk.bf16.vlgmr.msra.gmra.mrb[4].mxu0 %vm650_vm1, %v1798_v45  ;;  %1683 = vmatmul.mubr.msk.bf16.vlgmr.msra.gmra.mrb[4].mxu1 %vm650_vm1, %v1798_v45 }
 0x191   : > { %v1028_v17 = vpop.f32.mrb[0].mxu0  ;;  %v1071_v19 = vpop.f32.mrb[0].mxu1 }
 0x192   : > { %v2264_v18 = vadd.f32 %v1171_v13, %v1028_v17  ;;  %v1030_v20 = vpop.f32.mrb[1].mxu0  ;;  %v2266_v21 = vadd.f32 %v1179_v14, %v1071_v19  ;;  %v1073_v23 = vpop.f32.mrb[1].mxu1 }
 0x193   : > { %v2268_v22 = vadd.f32 %v1175_v15, %v1030_v20  ;;  %v1032_v24 = vpop.f32.mrb[2].mxu0  ;;  %v2271_v25 = vadd.f32 %v1183_v16, %v1073_v23  ;;  %v1075_v27 = vpop.f32.mrb[2].mxu1 }
 0x194   : > { %1227 = vst [vmem:[#allocation4] sm:$0xff] %v2264_v18  ;;  %v2273_v26 = vadd.f32 %v1171_v13, %v1032_v24  ;;  %v1034_v28 = vpop.f32.mrb[3].mxu0  ;;  %1229 = vst [vmem:[#allocation4 + $0x10] sm:$0xff] %v2266_v21  ;;  %v2277_v29 = vadd.f32 %v1179_v14, %v1075_v27  ;;  %v1077_v31 = vpop.f32.mrb[3].mxu1  ;;  %v1245_v42 = vmax.f32 %v2264_v18, %v2266_v21 }
 0x195   : > { %1228 = vst [vmem:[#allocation4 + $0x8] sm:$0xff] %v2268_v22  ;;  %v2279_v30 = vadd.f32 %v1175_v15, %v1034_v28  ;;  %1230 = vst [vmem:[#allocation4 + $0x18] sm:$0xff] %v2271_v25  ;;  %v2283_v32 = vadd.f32 %v1183_v16, %v1077_v31  ;;  %v1246_v46 = vmax.f32 %v2268_v22, %v2271_v25 }
 0x196   : > { %1235 = vst [vmem:[#allocation4 + $0x40] sm:$0xff] %v2273_v26  ;;  %1237 = vst [vmem:[#allocation4 + $0x50] sm:$0xff] %v2277_v29  ;;  %v1254_v51 = vmax.f32 %v2273_v26, %v2277_v29 }
 0x197   : > { %1236 = vst [vmem:[#allocation4 + $0x48] sm:$0xff] %v2279_v30  ;;  %1238 = vst [vmem:[#allocation4 + $0x58] sm:$0xff] %v2283_v32  ;;  %v1255_v57 = vmax.f32 %v2279_v30, %v2283_v32 }
 0x1a1   : > { %v1114_v41 = vpop.f32.mrb[4].mxu0  ;;  %v1157_v44 = vpop.f32.mrb[4].mxu1 }
 0x1a2   : > { %v2290_v43 = vadd.f32 %v1187_v37, %v1114_v41  ;;  %v1116_v45 = vpop.f32.mrb[5].mxu0  ;;  %v2294_v47 = vadd.f32 %v1195_v38, %v1157_v44  ;;  %v1159_v49 = vpop.f32.mrb[5].mxu1 }
 0x1a3   : > { %v2296_v48 = vadd.f32 %v1191_v39, %v1116_v45  ;;  %v1118_v50 = vpop.f32.mrb[6].mxu0  ;;  %v2301_v52 = vadd.f32 %v1199_v40, %v1159_v49  ;;  %v1161_v54 = vpop.f32.mrb[6].mxu1 }
 0x1a4   : > { %1231 = vst [vmem:[#allocation4 + $0x20] sm:$0xff] %v2290_v43  ;;  %v2303_v53 = vadd.f32 %v1187_v37, %v1118_v50  ;;  %v1120_v55 = vpop.f32.mrb[7].mxu0  ;;  %v1247_v56 = vmax.f32 %v1245_v42, %v2290_v43  ;;  %1233 = vst [vmem:[#allocation4 + $0x30] sm:$0xff] %v2294_v47  ;;  %v2310_v58 = vadd.f32 %v1195_v38, %v1161_v54  ;;  %v1163_v60 = vpop.f32.mrb[7].mxu1 }
 0x1a5   : > { %1232 = vst [vmem:[#allocation4 + $0x28] sm:$0xff] %v2296_v48  ;;  %v2312_v59 = vadd.f32 %v1191_v39, %v1120_v55  ;;  %v1248_v61 = vmax.f32 %v1246_v46, %v2296_v48  ;;  %1234 = vst [vmem:[#allocation4 + $0x38] sm:$0xff] %v2301_v52  ;;  %v2318_v63 = vadd.f32 %v1199_v40, %v1163_v60 }
 0x1a6   : > { %1239 = vst [vmem:[#allocation4 + $0x60] sm:$0xff] %v2303_v53  ;;  %v1256_v62 = vmax.f32 %v1254_v51, %v2303_v53  ;;  %v1249_v0 = vmax.f32 %v1247_v56, %v2294_v47  ;;  %1241 = vst [vmem:[#allocation4 + $0x70] sm:$0xff] %v2310_v58 }
 0x1a7   : > { %1240 = vst [vmem:[#allocation4 + $0x68] sm:$0xff] %v2312_v59  ;;  %v1257_v1 = vmax.f32 %v1255_v57, %v2312_v59  ;;  %v1250_v2 = vmax.f32 %v1248_v61, %v2301_v52  ;;  %1242 = vst [vmem:[#allocation4 + $0x78] sm:$0xff] %v2318_v63 }
 0x1a8   : > { %v1258_v4 = vmax.f32 %v1256_v62, %v2310_v58 }
 0x1a9   : > { %v1251_v3 = vmax.f32 %v1249_v0, %v1250_v2  ;;  %v1259_v5 = vmax.f32 %v1257_v1, %v2318_v63 }
 0x1ab   : > { %1252 = vmax.xlane.f32.xlu0 %v1251_v3  ;;  %v1260_v10 = vmax.f32 %v1258_v4, %v1259_v5 }
 0x1af   : > { %1261 = vmax.xlane.f32.xlu0 %v1260_v10 }
 0x238   : > { %v1253_v7 = vpop.xlane.xlu0 %1252 }
 0x239   : > { %v2331_v8 = vmax.f32 %v2328_v6, %v1253_v7 }
 0x23b   : > { %v1267_v11 = vsub.f32 %v2328_v6, %v2331_v8  ;;  %1356 = vst.msk [vmem:[#allocation2] sm:$0xff] %vm1353_vm2, %v2331_v8  ;;  %1277 = vperm.xlu1 %1795, %v2331_v8  }
 0x23c   : > { %v1262_v12 = vpop.xlane.xlu0 %1261 }
 0x23d   : > { %v2341_v13 = vmax.f32 %v2333_v9, %v1262_v12 }
 0x23f   : > { %v1268_v14 = vsub.f32 %v2333_v9, %v2341_v13  ;;  %1357 = vst.msk [vmem:[#allocation2 + $0x8] sm:$0xff] %vm1353_vm2, %v2341_v13  ;;  %1282 = vperm.xlu1 %1795, %v2341_v13  }
 0x2ba   : > { %v1278_v15 = vpop.permute.xlu1 %1277 }
 0x2bb   : > { %v1285_v16 = vsub.f32 %v2264_v18, %v1278_v15  ;;  %v1286_v17 = vsub.f32 %v2268_v22, %v1278_v15  ;;  %v1287_v19 = vsub.f32 %v2266_v21, %v1278_v15  ;;  %v1288_v20 = vsub.f32 %v2271_v25, %v1278_v15 }
 0x2bc   : > { %v1289_v33 = vsub.f32 %v2290_v43, %v1278_v15  ;;  %v1290_v22 = vsub.f32 %v2296_v48, %v1278_v15  ;;  %v1291_v21 = vsub.f32 %v2294_v47, %v1278_v15 }
 0x2bd   : > { %v1301_v23 = vmul.f32 1.442695, %v1285_v16  ;;  %v1303_v24 = vmul.f32 1.442695, %v1286_v17  ;;  %v1305_v27 = vmul.f32 1.442695, %v1287_v19 }
 0x2be   : > { %v1307_v28 = vmul.f32 1.442695, %v1288_v20  ;;  %v1283_v31 = vpop.permute.xlu1 %1282  ;;  %v1309_v39 = vmul.f32 1.442695, %v1289_v33  ;;  %v1313_v40 = vmul.f32 1.442695, %v1291_v21 }
 0x2bf   : > { %1799 = vpow2.f32 %v1301_v23  ;;  %v1293_v34 = vsub.f32 %v2273_v26, %v1283_v31  ;;  %v1294_v35 = vsub.f32 %v2279_v30, %v1283_v31  ;;  %v1295_v18 = vsub.f32 %v2277_v29, %v1283_v31 }
 0x2c0   : > { %1801 = vpow2.f32 %v1303_v24  ;;  %v1296_v38 = vsub.f32 %v2283_v32, %v1283_v31  ;;  %v1292_v26 = vsub.f32 %v2301_v52, %v1278_v15  ;;  %v1311_v30 = vmul.f32 1.442695, %v1290_v22  ;;  %v1266_v22 = vld [vmem:[#allocation3 + $0x8] sm:$0xff] }
 0x2c1   : > { %1803 = vpow2.f32 %v1305_v27  ;;  %v1317_v25 = vmul.f32 1.442695, %v1293_v34  ;;  %v1319_v36 = vmul.f32 1.442695, %v1294_v35  ;;  %v1321_v37 = vmul.f32 1.442695, %v1295_v18 }
 0x2c2   : > { %1805 = vpow2.f32 %v1307_v28  ;;  %v1297_v29 = vsub.f32 %v2303_v53, %v1283_v31  ;;  %v1323_v41 = vmul.f32 1.442695, %v1296_v38  ;;  %v1298_v42 = vsub.f32 %v2312_v59, %v1283_v31 }
 0x2c3   : > { %1807 = vpow2.f32 %v1317_v25  ;;  %v1315_v43 = vmul.f32 1.442695, %v1292_v26  ;;  %v1299_v44 = vsub.f32 %v2310_v58, %v1283_v31  ;;  %v1300_v47 = vsub.f32 %v2318_v63, %v1283_v31  ;;  %v1265_v31 = vld [vmem:[#allocation3] sm:$0xff] }
 0x2c4   : > { %1809 = vpow2.f32 %v1319_v36  ;;  %v1325_v32 = vmul.f32 1.442695, %v1297_v29  ;;  %v1327_v48 = vmul.f32 1.442695, %v1298_v42  ;;  %v1269_v24 = vmul.f32 1.442695, %v1267_v11 }
 0x2c5   : > { %1811 = vpow2.f32 %v1321_v37  ;;  %v1329_v52 = vmul.f32 1.442695, %v1299_v44  ;;  %v1331_v56 = vmul.f32 1.442695, %v1300_v47  ;;  %v1271_v27 = vmul.f32 1.442695, %v1268_v14 }
 0x2c6   : > { %1813 = vpow2.f32 %v1309_v39 }
 0x2c7   : > { %1815 = vpow2.f32 %v1311_v30 }
 0x2c8   : > { %1817 = vpow2.f32 %v1313_v40 }
 0x2c9   : > { %v1800_v45 = vpop.eup %1799  ;;  %1819 = vpow2.f32 %v1323_v41 }
 0x2ca   : > { %v1802_v46 = vpop.eup %1801  ;;  %1821 = vpow2.f32 %v1315_v43 }
 0x2cb   : > { %v1804_v49 = vpop.eup %1803  ;;  %v1333_v50 = vadd.f32 %v1802_v46, %v1800_v45  ;;  %1823 = vpow2.f32 %v1325_v32 }
 0x2cc   : > { %v1806_v51 = vpop.eup %1805  ;;  %1825 = vpow2.f32 %v1327_v48 }
 0x2cd   : > { %v1808_v53 = vpop.eup %1807  ;;  %v1334_v54 = vadd.f32 %v1804_v49, %v1333_v50  ;;  %1827 = vpow2.f32 %v1329_v52 }
 0x2ce   : > { %v1810_v55 = vpop.eup %1809  ;;  %1829 = vpow2.f32 %v1331_v56 }
 0x2cf   : > { %v1812_v57 = vpop.eup %1811  ;;  %v1335_v58 = vadd.f32 %v1806_v51, %v1334_v54  ;;  %v1342_v59 = vadd.f32 %v1810_v55, %v1808_v53  ;;  %1831 = vpow2.f32 %v1269_v24 }
 0x2d0   : > { %v1814_v60 = vpop.eup %1813  ;;  %1833 = vpow2.f32 %v1271_v27 }
 0x2d1   : > { %v1336_v61 = vadd.f32 %v1814_v60, %v1335_v58  ;;  %v1343_v62 = vadd.f32 %v1812_v57, %v1342_v59  ;;  %v1816_v63 = vpop.eup %1815 }
 0x2d2   : > { %v1818_v0 = vpop.eup %1817 }
 0x2d3   : > { %v1337_v1 = vadd.f32 %v1816_v63, %v1336_v61  ;;  %v1820_v2 = vpop.eup %1819 }
 0x2d4   : > { %v1822_v3 = vpop.eup %1821  ;;  %v1344_v5 = vadd.f32 %v1820_v2, %v1343_v62 }
 0x2d5   : > { %v1338_v4 = vadd.f32 %v1818_v0, %v1337_v1  ;;  %v1824_v10 = vpop.eup %1823 }
 0x2d6   : > { %v1345_v12 = vadd.f32 %v1824_v10, %v1344_v5  ;;  %v1826_v15 = vpop.eup %1825 }
 0x2d7   : > { %v1339_v7 = vadd.f32 %v1822_v3, %v1338_v4  ;;  %v1828_v17 = vpop.eup %1827 }
 0x2d8   : > { %v1346_v16 = vadd.f32 %v1826_v15, %v1345_v12  ;;  %v1830_v20 = vpop.eup %1829 }
 0x2d9   : > { %1340 = vadd.xlane.f32.xlu0 %v1339_v7  ;;  %v1832_v28 = vpop.eup %1831 }
 0x2da   : > { %v1347_v19 = vadd.f32 %v1828_v17, %v1346_v16  ;;  %v1273_v33 = vmul.f32 %v1832_v28, %v1265_v31  ;;  %v1834_v18 = vpop.eup %1833 }
 0x2db   : > { %v1274_v21 = vmul.f32 %v1834_v18, %v1266_v22 }
 0x2dc   : > { %v1348_v23 = vadd.f32 %v1830_v20, %v1347_v19 }
 0x2de   : > { %1349 = vadd.xlane.f32.xlu1 %v1348_v23 }
 0x366   : > { %v1341_v34 = vpop.xlane.xlu0 %1340 }
 0x367   : > { %v1351_v35 = vadd.f32 %v1341_v34, %v1273_v33 }
 0x369   : > { %1354 = vst.msk [vmem:[#allocation3] sm:$0xff] %vm1353_vm2, %v1351_v35 }
 0x36b   : > { %v1350_v25 = vpop.xlane.xlu1 %1349 }
 0x36c   : > { %v1352_v36 = vadd.f32 %v1350_v25, %v1274_v21 }
 0x36e   : > { %1355 = vst.msk [vmem:[#allocation3 + $0x8] sm:$0xff] %vm1353_vm2, %v1352_v36 }
 0x36f PF: > { %p1684_p5 = scmp.ne.s32.totalorder %s2008_s18, 1 }
 0x370   : > { %v1364_v6 = vld [vmem:[#allocation3] sm:$0xff] (!%p1684_p5)  ;;  %v2029_v8 = vmov (!%p1684_p5), 0   ;;  %v1362_v13 = vld [vmem:[#allocation2] sm:$0xff] (!%p1684_p5)  ;;  %v1363_v38 = vld [vmem:[#allocation2 + $0x8] sm:$0xff] (!%p1684_p5) }
 0x371   : > { %1361 = sbr.rel (%p1684_p5) target bundleno = 1035 (0x40b), region = 68  ;;  %1835 = vset.pattern.permute.xlu0 (!%p1684_p5), %v2029_v8  ;;  %1836 = vlog2.f32 (!%p1684_p5), %v1364_v6  ;;  %v1375_v29 = vld [vmem:[#allocation4] sm:$0xff] (!%p1684_p5)  ;;  %v1376_v40 = vld [vmem:[#allocation4 + $0x8] sm:$0xff] (!%p1684_p5)  ;;  %v1377_v41 = vld [vmem:[#allocation4 + $0x10] sm:$0xff] (!%p1684_p5) }
 0x372   : > { %v1378_v42 = vld [vmem:[#allocation4 + $0x18] sm:$0xff] (!%p1684_p5)  ;;  %v1379_v43 = vld [vmem:[#allocation4 + $0x20] sm:$0xff] (!%p1684_p5)  ;;  %v1380_v44 = vld [vmem:[#allocation4 + $0x28] sm:$0xff] (!%p1684_p5) }
 0x373   : > { %v1381_v32 = vld [vmem:[#allocation4 + $0x30] sm:$0xff] (!%p1684_p5)  ;;  %v1382_v45 = vld [vmem:[#allocation4 + $0x38] sm:$0xff] (!%p1684_p5)  ;;  %v1383_v51 = vld [vmem:[#allocation4 + $0x40] sm:$0xff] (!%p1684_p5) }
 0x374   : > { %v1384_v52 = vld [vmem:[#allocation4 + $0x48] sm:$0xff] (!%p1684_p5)  ;;  %v1385_v57 = vld [vmem:[#allocation4 + $0x50] sm:$0xff] (!%p1684_p5)  ;;  %v1386_v58 = vld [vmem:[#allocation4 + $0x58] sm:$0xff] (!%p1684_p5) }
 0x375   : > { %v1365_v9 = vld [vmem:[#allocation3 + $0x8] sm:$0xff] (!%p1684_p5)  ;;  %v1387_v59 = vld [vmem:[#allocation4 + $0x60] sm:$0xff] (!%p1684_p5)  ;;  %v1388_v60 = vld [vmem:[#allocation4 + $0x68] sm:$0xff] (!%p1684_p5) }
 0x376   : > { %1838 = vlog2.f32 (!%p1684_p5), %v1365_v9  ;;  %v1389_v61 = vld [vmem:[#allocation4 + $0x70] sm:$0xff] (!%p1684_p5)  ;;  %v1390_v62 = vld [vmem:[#allocation4 + $0x78] sm:$0xff] (!%p1684_p5) }
 0x37b   : > { %v1837_v11 = vpop.eup %1836 }
 0x37c   : > { %v1367_v37 = vmul.f32 0.6931472, %v1837_v11 }
 0x37e   : > { %v1370_v26 = vadd.f32 %v1367_v37, %v1362_v13 }
 0x380   : > { %v1839_v14 = vpop.eup %1838  ;;  %1393 = vperm.xlu0 %1835, %v1370_v26  }
 0x381   : > { %v1369_v39 = vmul.f32 0.6931472, %v1839_v14 }
 0x383   : > { %v1371_v30 = vadd.f32 %v1369_v39, %v1363_v38 }
 0x385   : > { %1398 = vperm.xlu0 %1835, %v1371_v30  }
 0x3ff   : > { %v1394_v46 = vpop.permute.xlu0 %1393 }
 0x400   : > { %v1401_v47 = vsub.f32 %v1375_v29, %v1394_v46  ;;  %v1402_v48 = vsub.f32 %v1376_v40, %v1394_v46  ;;  %v1403_v49 = vsub.f32 %v1377_v41, %v1394_v46  ;;  %v1404_v50 = vsub.f32 %v1378_v42, %v1394_v46 }
 0x401   : > { %v1405_v53 = vsub.f32 %v1379_v43, %v1394_v46  ;;  %v1406_v54 = vsub.f32 %v1380_v44, %v1394_v46  ;;  %v1407_v55 = vsub.f32 %v1381_v32, %v1394_v46  ;;  %v1408_v56 = vsub.f32 %v1382_v45, %v1394_v46 }
 0x402   : > { %1417 = vst [vmem:[#allocation12] sm:$0xff] %v1401_v47  ;;  %1418 = vst [vmem:[#allocation12 + $0x8] sm:$0xff] %v1402_v48 }
 0x403   : > { %1419 = vst [vmem:[#allocation12 + $0x10] sm:$0xff] %v1403_v49  ;;  %1420 = vst [vmem:[#allocation12 + $0x18] sm:$0xff] %v1404_v50 }
 0x404   : > { %1421 = vst [vmem:[#allocation12 + $0x20] sm:$0xff] %v1405_v53  ;;  %1422 = vst [vmem:[#allocation12 + $0x28] sm:$0xff] %v1406_v54  ;;  %v1399_v63 = vpop.permute.xlu0 %1398 }
 0x405   : > { %1423 = vst [vmem:[#allocation12 + $0x30] sm:$0xff] %v1407_v55  ;;  %1424 = vst [vmem:[#allocation12 + $0x38] sm:$0xff] %v1408_v56  ;;  %v1409_v0 = vsub.f32 %v1383_v51, %v1399_v63  ;;  %v1410_v1 = vsub.f32 %v1384_v52, %v1399_v63  ;;  %v1411_v2 = vsub.f32 %v1385_v57, %v1399_v63 }
 0x406   : > { %v1412_v3 = vsub.f32 %v1386_v58, %v1399_v63  ;;  %v1413_v4 = vsub.f32 %v1387_v59, %v1399_v63  ;;  %v1414_v5 = vsub.f32 %v1388_v60, %v1399_v63  ;;  %v1415_v10 = vsub.f32 %v1389_v61, %v1399_v63 }
 0x407   : > { %v1416_v7 = vsub.f32 %v1390_v62, %v1399_v63  ;;  %1425 = vst [vmem:[#allocation12 + $0x40] sm:$0xff] %v1409_v0  ;;  %1426 = vst [vmem:[#allocation12 + $0x48] sm:$0xff] %v1410_v1 }
 0x408   : > { %1427 = vst [vmem:[#allocation12 + $0x50] sm:$0xff] %v1411_v2  ;;  %1428 = vst [vmem:[#allocation12 + $0x58] sm:$0xff] %v1412_v3 }
 0x409   : > { %1429 = vst [vmem:[#allocation12 + $0x60] sm:$0xff] %v1413_v4  ;;  %1430 = vst [vmem:[#allocation12 + $0x68] sm:$0xff] %v1414_v5 }
 0x40a   : > { %1431 = vst [vmem:[#allocation12 + $0x70] sm:$0xff] %v1415_v10  ;;  %1432 = vst [vmem:[#allocation12 + $0x78] sm:$0xff] %v1416_v7 }
 0x40b PF: > { %p1753_p10 = scmp.eq.s32.totalorder %s2079_s21, 1  ;;  %s2030_s18 = smov [#allocation12]  }
 0x40c   : > { %s1451_s14 = sshll.u32 %s2030_s18, 4  ;;  %s1452_s14 = int_to_ptr.vmem [resolvable:$true] %s1451_s14 }
 0x40d   : > { %s1952_s15 = scalar_lea.vmem %s1452_s14, 2048  ;;  %s1958_s9 = scalar_lea.vmem %s1452_s14, 4096 }
 0x40e   : > { %p1953_p12 = scmp.ne.s32.totalorder %s1452_s14, %s1952_s15  ;;  %p1959_p7 = scmp.lt.s32.totalorder %s1452_s14, %s1452_s14 }
 0x40f   : > { %p1960_p8 = scmp.lt.s32.totalorder %s1958_s9, %s1952_s15 }
 0x410   : > { %p1954_p4 = pnand %p1953_p12, %p1753_p10 }
 0x411   : > { %p1961_p9 = por %p1960_p8, %p1959_p7 }
 0x412   : > { %p1955_p6 = pneg %p1954_p4 }
 0x414   : > { %p1962_p13 = pnand %p1961_p9, %p1955_p6 }
 0x416   : > { %1965 = shalt.err (!%p1962_p13)
}
 0x417   : > { %s1966_s8 = scalar_lea.hbm %s2410_s5, 2048 }
 0x418   : > { %p1967_p0 = scmp.ne.s32.totalorder %s2410_s5, %s1966_s8  ;;  %p1972_p1 = scmp.lt.u32.totalorder %s1966_s8, %s2410_s5 }
 0x41a   : > { %p1968_p3 = pnand %p1967_p0, %p1753_p10 }
 0x41c   : > { %p1969_p11 = pneg %p1968_p3 }
 0x41e   : > { %p1974_p2 = pnand %p1972_p1, %p1969_p11 }
 0x420   : > { %1977 = shalt.err (!%p1974_p2)
}
 0x421   : > { %s2031_s27 = smov 1024   ;;  %s2032_s17 = smov 64  }
 0x422   : > { %1723 = dma.vmem_to_hbm [thread:$0]  (%p1753_p10), %s1452_s14, 2048, %s2410_s5, [#allocation7], %s2031_s27, %s2031_s27, %s2032_s17  }
 0x423 PF: > { %s2437_s7 = sadd.s32 4294967294, %s2016_s20   ;;  %p2438_p12 = scmp.ge.s32.totalorder %s2016_s20, 2 }
 0x424   : > { %p1755_p5 = scmp.eq.s32.totalorder %s2437_s7, 1 }
 0x426   : > { %p1741_p4 = pnand %p1755_p5, %p2438_p12 }
 0x428   : > { %2003 = dma.done.wait (!%p1741_p4), [#allocation7], 2048  }
 0x429   : > { %2005 = vsyncadd (!%p1741_p4), [#allocation7], 4294965248  ;;  %s20_s20 = sadd.s32 1, %s2016_s20   ;;  %s2439_s18 = smov %s2012_s19 }
 0x42a   : > { %p17_p6 = scmp.ge.s32.totalorder %s20_s20, 4   ;;  %s2440_s19 = smov %s2442_s23 }
 0x42c   :  { %19 = sbr.rel (!%p17_p6) target bundleno = 5 (0x5), region = 122 }
 0x433   :  { %1472 = vsyncpa [#allocation6], 1 }
 0x434   :  { %1474 = vsyncpa [#allocation6 + $0x1], 1 }
 0x435   :  { %1475 = vsyncpa [#allocation9], 1 }
 0x436   :  { %1476 = vsyncpa [#allocation7], 1 }
 0x437   :  { %1478 = vsyncpa [#allocation7 + $0x1], 1 }

</bundles_post_ra>
